<compile_context>
chip_gen: v7x
topology: tpu7x:2x2x1
jax: 0.10.0
libtpu: 0.0.40
codegen_flags: <defaults>
</compile_context>

<pallas_src>
import functools
import math

import jax
import jax.numpy as jnp
from jax import lax
from jax.experimental import pallas as pl
from jax.experimental.pallas import tpu as pltpu


# ----------------------------- sizing helpers -------------------------------


def _round_up(x, m):
    return ((x + m - 1) // m) * m


def _round_down(x, m):
    return (x // m) * m


def _sublane_pack(dtype):
    itemsize = jnp.dtype(dtype).itemsize
    return {4: 8, 2: 16, 1: 32}.get(itemsize, 8)


def _query_vmem_limit_bytes():
    cap = None
    try:
        cap = getattr(pltpu.get_tpu_info(), "vmem_capacity_bytes", None)
    except Exception:
        cap = None
    if not cap:
        cap = 64 * 1024 * 1024          # conservative: v7x per-core VMEM
    if cap >= 112 * 1024 * 1024:        # 128-MiB parts (v5e / v6e)
        return 96 * 1024 * 1024
    return 48 * 1024 * 1024             # safe on v7x (64 MiB physical)


_VMEM_LIMIT_BYTES = _query_vmem_limit_bytes()
# Per-step residency budget; ~40% slack for pipeline bookkeeping / spills.
_RESIDENT_BUDGET_BYTES = (_VMEM_LIMIT_BYTES * 3) // 5


def _max_block_elems(dtype):
    """Block-element budget: 2x input + 2x output double buffers in the I/O
    dtype plus ~4 live f32 temporaries (upcast, centered, normalized, cast)."""
    itemsize = jnp.dtype(dtype).itemsize
    return max(8 * 128, _RESIDENT_BUDGET_BYTES // (4 * itemsize + 16))


# ----------------------------- kernels --------------------------------------


def _ln_channels_first_kernel(x_ref, w_ref, b_ref, o_ref, *, eps):
    # x_ref: (nb, C, t); reduction over C (sublanes).  w_ref/b_ref: (C, 1).
    x = x_ref[...].astype(jnp.float32)
    u = jnp.mean(x, axis=1, keepdims=True)
    d = x - u
    s = jnp.mean(d * d, axis=1, keepdims=True)          # biased variance
    y = d * lax.rsqrt(s + eps)
    w = w_ref[...].astype(jnp.float32)[None, :, :]
    b = b_ref[...].astype(jnp.float32)[None, :, :]
    o_ref[...] = (w * y + b).astype(o_ref.dtype)


def _ln_channels_last_kernel(x_ref, w_ref, b_ref, o_ref, *, eps):
    # x_ref: (tm, C); reduction over C (lanes).  w_ref/b_ref: (1, C).
    x = x_ref[...].astype(jnp.float32)
    u = jnp.mean(x, axis=-1, keepdims=True)
    d = x - u
    s = jnp.mean(d * d, axis=-1, keepdims=True)          # biased variance
    y = d * lax.rsqrt(s + eps)
    o_ref[...] = (w_ref[...].astype(jnp.float32) * y
                  + b_ref[...].astype(jnp.float32)).astype(o_ref.dtype)


def _ln_grouped_kernel(x_ref, a_ref, w_ref, b_ref, o_ref, *, eps):
    # x_ref: (tr, W) where each row holds g groups of C channels (W = g*C).
    # a_ref: (W, W) block-diagonal averaging matrix (1/C inside each CxC
    # block).  x @ a reduces AND broadcasts the per-group mean across the
    # group's lanes in one op on the otherwise-idle MXU.
    x = x_ref[...].astype(jnp.float32)
    a = a_ref[...]
    u = jnp.dot(x, a, precision=lax.Precision.HIGHEST,
                preferred_element_type=jnp.float32)
    d = x - u
    s = jnp.dot(d * d, a, precision=lax.Precision.HIGHEST,
                preferred_element_type=jnp.float32)      # biased variance
    y = d * lax.rsqrt(s + eps)
    o_ref[...] = (w_ref[...] * y + b_ref[...]).astype(o_ref.dtype)


# ----------------------------- channels_first core --------------------------


def _layer_norm_cf_core(x3, weight, bias, eps):
    """LayerNorm over axis=1 of x3: (N, C, L) -> (N, C, L).

    No HBM padding/slicing: the last block dim is either the full L (legal
    for any L) or a 128-multiple tile with a masked partial edge block."""
    N, C, L = x3.shape
    pack = _sublane_pack(x3.dtype)
    c_pad = _round_up(C, pack)                  # physical sublane footprint
    max_elems = _max_block_elems(x3.dtype)

    if c_pad * L <= max_elems:
        t = L                                   # full-extent last dim
        # Fold batch elements per step, but keep >= min(8, N) grid steps so
        # the DMA pipeline / v7x megacore still overlaps prologue/epilogue.
        max_nb = min(max(1, max_elems // (c_pad * L)),
                     max(1, N // min(8, N)))
        nb = 1
        for d in range(1, N + 1):
            if N % d == 0 and d <= max_nb:
                nb = d
        grid = (N // nb, 1)
    else:
        nb = 1
        t = max(128, _round_down(max_elems // c_pad, 128))
        if t >= L:
            t = L
        # TODO(synk): for extreme C (c_pad*128*itemsize > budget) even t=128
        # overshoots the budget; SAFMN channel counts never get there.
        grid = (N, pl.cdiv(L, t))

    w2 = weight.reshape(C, 1).astype(jnp.float32)
    b2 = bias.reshape(C, 1).astype(jnp.float32)

    kernel = functools.partial(_ln_channels_first_kernel, eps=eps)
    return pl.pallas_call(
        kernel,
        out_shape=jax.ShapeDtypeStruct((N, C, L), x3.dtype),
        grid_spec=pltpu.PrefetchScalarGridSpec(
            num_scalar_prefetch=0,
            grid=grid,
            in_specs=[
                pl.BlockSpec((nb, C, t), lambda n, j: (n, 0, j)),
                pl.BlockSpec((C, 1), lambda n, j: (0, 0)),
                pl.BlockSpec((C, 1), lambda n, j: (0, 0)),
            ],
            out_specs=pl.BlockSpec((nb, C, t), lambda n, j: (n, 0, j)),
        ),
        compiler_params=pltpu.CompilerParams(
            dimension_semantics=("parallel", "parallel"),
            vmem_limit_bytes=_VMEM_LIMIT_BYTES,
        ),
    )(x3, w2, b2)


# ----------------------------- channels_last paths --------------------------


def _layer_norm_cl_direct(x2, weight, bias, eps):
    """(M, C) rows normalized over C with a lane-dense (tm, C) block."""
    M, C = x2.shape
    pack = _sublane_pack(x2.dtype)
    lane_c = _round_up(C, 128)
    max_elems = _max_block_elems(x2.dtype)
    tm = max_elems // lane_c
    if tm >= M:
        tm = M                                   # full extent: always legal
    else:
        tm = max(pack, _round_down(tm, pack))    # partial edge block is fine

    w2 = weight.reshape(1, C).astype(jnp.float32)
    b2 = bias.reshape(1, C).astype(jnp.float32)

    kernel = functools.partial(_ln_channels_last_kernel, eps=eps)
    return pl.pallas_call(
        kernel,
        out_shape=jax.ShapeDtypeStruct((M, C), x2.dtype),
        grid_spec=pltpu.PrefetchScalarGridSpec(
            num_scalar_prefetch=0,
            grid=(pl.cdiv(M, tm),),
            in_specs=[
                pl.BlockSpec((tm, C), lambda i: (i, 0)),
                pl.BlockSpec((1, C), lambda i: (0, 0)),
                pl.BlockSpec((1, C), lambda i: (0, 0)),
            ],
            out_specs=pl.BlockSpec((tm, C), lambda i: (i, 0)),
        ),
        compiler_params=pltpu.CompilerParams(
            dimension_semantics=("parallel",),
            vmem_limit_bytes=_VMEM_LIMIT_BYTES,
        ),
    )(x2, w2, b2)


def _pick_group_size(M, C):
    """Pick g dividing M that maximizes lane density of W = g*C (W <= 256),
    preferring the smallest such W (keeps the MXU group-mean matmuls cheap)."""
    best_g = 1
    best_density = C / _round_up(C, 128)
    gmax = max(1, 256 // C)
    for g in range(2, gmax + 1):
        if M % g:
            continue
        w = g * C
        density = w / _round_up(w, 128)
        if density > best_density + 1e-9:
            best_g, best_density = g, density
    return best_g


def _layer_norm_cl_grouped(x2, weight, bias, eps, g):
    """Small-C path: free contiguous reshape (M, C) -> (M/g, g*C), grouped
    mean/variance via a block-diagonal averaging matmul (no transposes)."""
    M, C = x2.shape
    W = g * C
    R = M // g
    x2g = x2.reshape(R, W)          # contiguous reshape: no extra HBM pass

    idx = jnp.arange(W, dtype=jnp.int32) // C
    a = (idx[:, None] == idx[None, :]).astype(jnp.float32) * (1.0 / C)
    wt = jnp.tile(weight.astype(jnp.float32).reshape(-1), g).reshape(1, W)
    bt = jnp.tile(bias.astype(jnp.float32).reshape(-1), g).reshape(1, W)

    pack = _sublane_pack(x2.dtype)
    lane_w = _round_up(W, 128)
    max_elems = _max_block_elems(x2.dtype)
    tr = max_elems // lane_w
    if tr >= R:
        tr = R
    else:
        tr = max(pack, _round_down(tr, pack))

    kernel = functools.partial(_ln_grouped_kernel, eps=eps)
    out = pl.pallas_call(
        kernel,
        out_shape=jax.ShapeDtypeStruct((R, W), x2.dtype),
        grid_spec=pltpu.PrefetchScalarGridSpec(
            num_scalar_prefetch=0,
            grid=(pl.cdiv(R, tr),),
            in_specs=[
                pl.BlockSpec((tr, W), lambda i: (i, 0)),
                pl.BlockSpec((W, W), lambda i: (0, 0)),
                pl.BlockSpec((1, W), lambda i: (0, 0)),
                pl.BlockSpec((1, W), lambda i: (0, 0)),
            ],
            out_specs=pl.BlockSpec((tr, W), lambda i: (i, 0)),
        ),
        compiler_params=pltpu.CompilerParams(
            dimension_semantics=("parallel",),
            vmem_limit_bytes=_VMEM_LIMIT_BYTES,
        ),
    )(x2g, a, wt, bt)
    return out.reshape(M, C)


# ----------------------------- public wrappers -------------------------------


def layer_norm_channels_first(x, weight, bias, eps=1e-6):
    """x: (N, C, *spatial)   weight/bias: (C,)   -> same shape as x."""
    N, C = x.shape[0], x.shape[1]
    spatial = x.shape[2:]
    L = int(math.prod(spatial)) if spatial else 1
    out = _layer_norm_cf_core(x.reshape(N, C, L), weight, bias, eps)
    return out.reshape(x.shape)


def layer_norm_channels_last(x, weight, bias, eps=1e-6, *, small_c_threshold=128):
    """x: (..., C)   weight/bias: (C,)   -> (..., C)"""
    C = x.shape[-1]
    lead = x.shape[:-1]
    M = int(math.prod(lead)) if lead else 1
    x2 = x.reshape(M, C)

    if C < small_c_threshold:
        g = _pick_group_size(M, C)
        if g > 1:
            out2 = _layer_norm_cl_grouped(x2, weight, bias, eps, g)
        else:
            out2 = _layer_norm_cl_direct(x2, weight, bias, eps)
    else:
        out2 = _layer_norm_cl_direct(x2, weight, bias, eps)
    return out2.reshape(*lead, C)


class LayerNormPallas:
    """Mirror of the PyTorch LayerNorm module (safmn_arch.py)."""

    def __init__(self, normalized_shape, eps=1e-6, data_format="channels_first"):
        if data_format not in ["channels_last", "channels_first"]:
            raise NotImplementedError
        self.weight = jnp.ones((normalized_shape,), dtype=jnp.float32)
        self.bias = jnp.zeros((normalized_shape,), dtype=jnp.float32)
        self.eps = eps
        self.data_format = data_format

    def __call__(self, x):
        if self.data_format == "channels_last":
            return layer_norm_channels_last(x, self.weight, self.bias, self.eps)
        return layer_norm_channels_first(x, self.weight, self.bias, self.eps)


# ----------------------------- references ------------------------------------


def _ref_channels_first(x, w, b, eps):
    u = jnp.mean(x, axis=1, keepdims=True)
    s = jnp.mean((x - u) ** 2, axis=1, keepdims=True)
    y = (x - u) / jnp.sqrt(s + eps)
    return w[None, :, None, None] * y + b[None, :, None, None]


def _ref_channels_last(x, w, b, eps):
    u = jnp.mean(x, axis=-1, keepdims=True)
    s = jnp.mean((x - u) ** 2, axis=-1, keepdims=True)
    y = (x - u) / jnp.sqrt(s + eps)
    return w * y + b


# ----------------------------- main -------------------------------------------

if __name__ == "__main__":
    key = jax.random.PRNGKey(0)
    k1, k2, k3, k4 = jax.random.split(key, 4)

    # channels_first (NCHW), the module's default path.
    N, C, H, W = 2, 4, 16, 16
    x_cf = jax.random.normal(k1, (N, C, H, W), dtype=jnp.float32)
    ln_cf = LayerNormPallas(C, eps=1e-6, data_format="channels_first")
    ln_cf.weight = jnp.linspace(0.5, 1.5, C, dtype=jnp.float32)
    ln_cf.bias = jnp.linspace(-0.2, 0.2, C, dtype=jnp.float32)
    out_cf = jax.block_until_ready(ln_cf(x_cf))
    ref_cf = _ref_channels_first(x_cf, ln_cf.weight, ln_cf.bias, ln_cf.eps)
    assert out_cf.shape == (N, C, H, W)
    assert jnp.max(jnp.abs(out_cf - ref_cf)) < 1e-4

    # channels_first with spatial extent that is not a multiple of 128
    # (exercises the full-extent last dim: no padding pass, no slicing pass).
    x_cf2 = jax.random.normal(k2, (2, 4, 7, 9), dtype=jnp.float32)
    out_cf2 = jax.block_until_ready(ln_cf(x_cf2))
    ref_cf2 = _ref_channels_first(x_cf2, ln_cf.weight, ln_cf.bias, ln_cf.eps)
    assert out_cf2.shape == (2, 4, 7, 9)
    assert jnp.max(jnp.abs(out_cf2 - ref_cf2)) < 1e-4

    # channels_last, small C -> grouped lane-dense kernel (MXU group mean).
    x_cl = jax.random.normal(k3, (2, 16, 16, 4), dtype=jnp.float32)
    ln_cl = LayerNormPallas(4, eps=1e-6, data_format="channels_last")
    ln_cl.weight = jnp.linspace(1.0, 2.0, 4, dtype=jnp.float32)
    ln_cl.bias = jnp.linspace(0.1, -0.1, 4, dtype=jnp.float32)
    out_cl = jax.block_until_ready(ln_cl(x_cl))
    ref_cl = _ref_channels_last(x_cl, ln_cl.weight, ln_cl.bias, ln_cl.eps)
    assert out_cl.shape == (2, 16, 16, 4)
    assert jnp.max(jnp.abs(out_cl - ref_cl)) < 1e-4

    # channels_last, C >= 128 -> direct lane-dense (tm, C) kernel.
    Cb = 128
    x_cl2 = jax.random.normal(k4, (2, 8, 8, Cb), dtype=jnp.float32)
    ln_cl2 = LayerNormPallas(Cb, eps=1e-6, data_format="channels_last")
    ln_cl2.weight = jnp.linspace(0.8, 1.2, Cb, dtype=jnp.float32)
    ln_cl2.bias = jnp.linspace(-0.05, 0.05, Cb, dtype=jnp.float32)
    out_cl2 = jax.block_until_ready(ln_cl2(x_cl2))
    ref_cl2 = _ref_channels_last(x_cl2, ln_cl2.weight, ln_cl2.bias, ln_cl2.eps)
    assert out_cl2.shape == (2, 8, 8, Cb)
    assert jnp.max(jnp.abs(out_cl2 - ref_cl2)) < 1e-4

    print("KERNEL_OK")
</pallas_src>

<mosaic_0001>
module attributes {stable_mosaic.version = 11 : i64} {
  func.func @_ln_channels_first_kernel(%arg0: i32, %arg1: i32, %arg2: memref<1x4x256xf32, #tpu.memory_space<vmem>>, %arg3: memref<4x1xf32, #tpu.memory_space<vmem>>, %arg4: memref<4x1xf32, #tpu.memory_space<vmem>>, %arg5: memref<1x4x256xf32, #tpu.memory_space<vmem>>) attributes {dimension_semantics = [#tpu.dimension_semantics<parallel>, #tpu.dimension_semantics<parallel>], iteration_bounds = array<i64: 2, 1>, scalar_prefetch = 0 : i64, scratch_operands = 0 : i64, tpu.core_type = #tpu.core_type<tc>, window_params = [{transform_indices = @transform_0, window_bounds = array<i64: 1, 4, 256>}, {pipeline_mode = #tpu.pipeline_mode<synchronous>, transform_indices = @transform_1, window_bounds = array<i64: 4, 1>}, {pipeline_mode = #tpu.pipeline_mode<synchronous>, transform_indices = @transform_2, window_bounds = array<i64: 4, 1>}, {transform_indices = @transform_3, window_bounds = array<i64: 1, 4, 256>}]} {
    %c0 = arith.constant 0 : index
    %c0_0 = arith.constant 0 : index
    %c0_1 = arith.constant 0 : index
    %0 = vector.load %arg2[%c0, %c0_0, %c0_1] : memref<1x4x256xf32, #tpu.memory_space<vmem>>, vector<1x4x256xf32>
    %cst = arith.constant dense<0.000000e+00> : vector<1x256xf32>
    %1 = vector.multi_reduction <add>, %0, %cst [1] : vector<1x4x256xf32> to vector<1x256xf32>
    %2 = vector.shape_cast %1 : vector<1x256xf32> to vector<1x1x256xf32>
    %cst_2 = arith.constant 4.000000e+00 : f32
    %3 = vector.broadcast %cst_2 : f32 to vector<1x1x256xf32>
    %4 = arith.divf %2, %3 : vector<1x1x256xf32>
    %5 = vector.broadcast %4 : vector<1x1x256xf32> to vector<1x4x256xf32>
    %6 = arith.subf %0, %5 : vector<1x4x256xf32>
    %7 = arith.mulf %6, %6 : vector<1x4x256xf32>
    %cst_3 = arith.constant dense<0.000000e+00> : vector<1x256xf32>
    %8 = vector.multi_reduction <add>, %7, %cst_3 [1] : vector<1x4x256xf32> to vector<1x256xf32>
    %9 = vector.shape_cast %8 : vector<1x256xf32> to vector<1x1x256xf32>
    %cst_4 = arith.constant 4.000000e+00 : f32
    %10 = vector.broadcast %cst_4 : f32 to vector<1x1x256xf32>
    %11 = arith.divf %9, %10 : vector<1x1x256xf32>
    %cst_5 = arith.constant 9.99999997E-7 : f32
    %12 = vector.broadcast %cst_5 : f32 to vector<1x1x256xf32>
    %13 = arith.addf %11, %12 : vector<1x1x256xf32>
    %14 = math.rsqrt %13 : vector<1x1x256xf32>
    %15 = vector.broadcast %14 : vector<1x1x256xf32> to vector<1x4x256xf32>
    %16 = arith.mulf %6, %15 : vector<1x4x256xf32>
    %c0_6 = arith.constant 0 : index
    %c0_7 = arith.constant 0 : index
    %17 = vector.load %arg3[%c0_6, %c0_7] : memref<4x1xf32, #tpu.memory_space<vmem>>, vector<4x1xf32>
    %18 = vector.shape_cast %17 : vector<4x1xf32> to vector<1x4x1xf32>
    %c0_8 = arith.constant 0 : index
    %c0_9 = arith.constant 0 : index
    %19 = vector.load %arg4[%c0_8, %c0_9] : memref<4x1xf32, #tpu.memory_space<vmem>>, vector<4x1xf32>
    %20 = vector.shape_cast %19 : vector<4x1xf32> to vector<1x4x1xf32>
    %21 = vector.broadcast %18 : vector<1x4x1xf32> to vector<1x4x256xf32>
    %22 = arith.mulf %21, %16 : vector<1x4x256xf32>
    %23 = vector.broadcast %20 : vector<1x4x1xf32> to vector<1x4x256xf32>
    %24 = arith.addf %22, %23 : vector<1x4x256xf32>
    %c0_10 = arith.constant 0 : index
    %c0_11 = arith.constant 0 : index
    %c0_12 = arith.constant 0 : index
    %25 = vector.load %arg5[%c0_10, %c0_11, %c0_12] : memref<1x4x256xf32, #tpu.memory_space<vmem>>, vector<1x4x256xf32>
    tpu.vector_store %arg5[%c0_10, %c0_11, %c0_12], %24 {strides = array<i32>} : memref<1x4x256xf32, #tpu.memory_space<vmem>>, vector<1x4x256xf32>,
    return
  }
  func.func @transform_0(%arg0: i32, %arg1: i32) -> (i32, i32, i32) {
    %c0_i32 = arith.constant 0 : i32
    %c0_i32_0 = arith.constant 0 : i32
    return %arg0, %c0_i32, %arg1 : i32, i32, i32
  }
  func.func @transform_1(%arg0: i32, %arg1: i32) -> (i32, i32) {
    %c0_i32 = arith.constant 0 : i32
    %c0_i32_0 = arith.constant 0 : i32
    %c0_i32_1 = arith.constant 0 : i32
    return %c0_i32, %c0_i32_0 : i32, i32
  }
  func.func @transform_2(%arg0: i32, %arg1: i32) -> (i32, i32) {
    %c0_i32 = arith.constant 0 : i32
    %c0_i32_0 = arith.constant 0 : i32
    %c0_i32_1 = arith.constant 0 : i32
    return %c0_i32, %c0_i32_0 : i32, i32
  }
  func.func @transform_3(%arg0: i32, %arg1: i32) -> (i32, i32, i32) {
    %c0_i32 = arith.constant 0 : i32
    %c0_i32_0 = arith.constant 0 : i32
    return %arg0, %c0_i32, %arg1 : i32, i32, i32
  }
}

</mosaic_0001>

<bundles_post_ra>
// kernel: tpu_custom_call.1
= control target key start
LH: loop header
LB: loop body
LE: loop exit
PB: predicated region body
PF: predicated region fallthrough
CT: control target
= control target key end

     0   :  { %8 = vsyncpa [#allocation3], 0  ;;  %s797_s0 = inlined_call_operand.hbm [shape: f32[2,4,256], index: 0, kind: input, shape index: {}]   ;;  %s798_s1 = inlined_call_operand.vmem [shape: f32[4,1], index: 1, kind: input, shape index: {}]   ;;  %s799_s2 = inlined_call_operand.vmem [shape: f32[4,1], index: 2, kind: input, shape index: {}]   ;;  %s800_s3 = inlined_call_operand.hbm [shape: f32[2,4,256], index: 3, kind: output, shape index: {}]  }
   0x1   :  { %10 = vsyncpa [#allocation3 + $0x1], 0 }
   0x2   :  { %11 = vsyncpa [#allocation4], 0 }
   0x3   :  { %13 = vsyncpa [#allocation4 + $0x1], 0  ;;  %s611_s12 = smov 0   ;;  %s613_s13 = smov 0  }
   0x4   :  { %s615_s14 = smov 0   ;;  %s617_s15 = smov 0  }
   0x5   :  { %s619_s16 = smov 0   ;;  %s621_s17 = smov 0  }
   0x6 LB: > { %s388_s18 = sadd.s32 4294967295, %s586_s17   ;;  %s389_s19 = sadd.s32 4294967294, %s586_s17   ;;  %s586_s17 = sphi %s621_s17, %s19_s17   ;;  %s582_s16 = sphi %s619_s16, %s816_s16   ;;  %s578_s15 = sphi %s617_s15, %s815_s15   ;;  %s574_s14 = sphi %s615_s14, %s814_s14   ;;  %s570_s13 = sphi %s613_s13, %s813_s13   ;;  %s566_s12 = sphi %s611_s12, %s812_s12  }
   0x7   : > { %s31_s20 = sadd.s32 1, %s582_s16  ;;  %s40_s21 = sadd.s32 1, %s574_s14 }
   0x8   : > { %p33_p0 = scmp.ge.s32.totalorder %s31_s20, 2  ;;  %p47_p1 = scmp.ne.s32.totalorder %s574_s14, %s570_s13 }
   0x9   : > { %p48_p2 = scmp.eq.s32.totalorder %s586_s17, 0  ;;  %p53_p3 = scmp.ne.s32.totalorder %s570_s13, %s566_s12 }
   0xa   : > { %s818_s20 = smov (%p33_p0, %s31_s20), 0  ;;  %p54_p5 = scmp.eq.s32.totalorder %s388_s18, 0 }
   0xb   : > { %p652_p4 = por %p48_p2, %p47_p1  ;;  %s35_s23 = ssub.s32 %s582_s16, %s818_s20 }
   0xc   : > { %p121_p6 = scmp.eq.s32.totalorder %s388_s18, 1  ;;  %p38_p7 = scmp.eq.s32.totalorder %s35_s23, 0 }
   0xd   : > { %p658_p8 = por %p54_p5, %p53_p3  ;;  %p127_p10 = scmp.eq.s32.totalorder %s389_s19, 1 }
   0xe   : > { %p662_p9 = por %p121_p6, %p47_p1  ;;  %p417_p13 = scmp.lt.s32.totalorder %s586_s17, 2 }
   0xf   : > { %s667_s26 = scalar_select %p38_p7, %s574_s14, %s40_s21  }
  0x10   : > { %s804_s25 = scalar_select %p662_p9, 1, 0 }
  0x11   : > { %p669_p11 = por %p127_p10, %p53_p3  ;;  %s153_s28 = sand.u32 1, %s574_s14  }
  0x12   : > { %s392_s29 = sshll.u32 %s153_s28, 3  ;;  %s403_s30 = sshll.u32 %s582_s16, 7 }
  0x13   : > { %s805_s27 = scalar_select %p669_p11, 1, 0 }
  0x14   : > { %s680_s6 = scalar_lea.hbm %s797_s0, %s403_s30  ;;  %s157_s7 = scalar_lea.vmem [#allocation2], %s392_s29 }
  0x15   : > { %s167_s8 = sshll.u32 %s157_s7, 4  ;;  %p686_p0 = pnand %p417_p13, %p652_p4  ;;  %s682_s8 = int_to_ptr.vmem [resolvable:$true] %s167_s8 }
  0x16   : > { %s154_s10 = scalar_lea.sflag [#allocation3], %s153_s28  ;;  %s474_s11 = scalar_lea.hbm %s680_s6, 128 }
  0x17   : > { %p475_p3 = scmp.ne.s32.totalorder %s680_s6, %s474_s11  ;;  %p476_p5 = pneg %p686_p0 }
  0x18   : > { %s479_s21 = scalar_lea.hbm %s797_s0, 256  ;;  %p480_p4 = scmp.lt.u32.totalorder %s680_s6, %s797_s0 }
  0x19   : > { %p477_p6 = pnand %p476_p5, %p475_p3  ;;  %p481_p10 = scmp.lt.u32.totalorder %s479_s21, %s474_s11 }
  0x1a   : > { %p483_p12 = scmp.lt.u32.totalorder %s474_s11, %s680_s6 }
  0x1b   : > { %p478_p7 = pneg %p477_p6  ;;  %p482_p13 = por %p481_p10, %p480_p4 }
  0x1d   : > { %p484_p1 = por %p483_p12, %p482_p13 }
  0x1f   : > { %p485_p2 = pnand %p484_p1, %p478_p7 }
  0x21   : > { %488 = shalt.err (!%p485_p2)
}
  0x22   : > { %s489_s28 = scalar_lea.vmem %s682_s8, 128  ;;  %s588_s29 = smov [#allocation2]  }
  0x23   : > { %p490_p3 = scmp.ne.s32.totalorder %s682_s8, %s489_s28  ;;  %s494_s30 = sshll.u32 %s588_s29, 4  ;;  %s495_s30 = int_to_ptr.vmem [resolvable:$false] %s494_s30 }
  0x24   : > { %s496_s4 = scalar_lea.vmem %s495_s30, 256  ;;  %p497_p9 = scmp.lt.s32.totalorder %s682_s8, %s495_s30 }
  0x25   : > { %p492_p6 = pnand %p490_p3, %p476_p5  ;;  %p498_p4 = scmp.lt.s32.totalorder %s496_s4, %s489_s28 }
  0x27   : > { %p493_p11 = pneg %p492_p6  ;;  %p499_p10 = por %p498_p4, %p497_p9 }
  0x29   : > { %p500_p12 = pnand %p499_p10, %p493_p11 }
  0x2b   : > { %503 = shalt.err (!%p500_p12)
}
  0x2c   : > { %412 = dma.hbm_to_vmem [thread:$0]  (!%p686_p0), %s680_s6, 128, %s682_s8, %s154_s10  }
  0x2d   : > { %p807_p1 = scmp.lt.s32.totalorder %s586_s17, 3  ;;  %p808_p2 = scmp.ge.s32.totalorder %s586_s17, 1 }
  0x2f   : > { %p173_p5 = pnand %p808_p2, %p807_p1 }
  0x30   : > { %s722_s5 = sand.u32 (!%p173_p5), 1, %s570_s13  }
  0x31   : > { %176 = sbr.rel (%p173_p5) target bundleno = 209 (0xd1), region = 32  ;;  %s396_s7 = sshll.u32 (!%p173_p5), %s722_s5, 3 }
  0x32   : > { %s179_s11 = scalar_lea.sflag (!%p173_p5), [#allocation3], %s722_s5  ;;  %s182_s9 = scalar_lea.vmem (!%p173_p5), [#allocation2], %s396_s7 }
  0x38   : > { %557 = dma.done.wait (%p658_p8), %s179_s11, 128  }
  0x39   : > { %559 = vsyncadd (%p658_p8), %s179_s11, 4294967168  ;;  %v589_v0 = vmov 0   ;;  %v263_v1 = vld [vmem:[%s798_s1] sm:$0xf]  ;;  %vm211_vm0 = vcmask 1043456   ;;  %s404_s24 = sshll.u32 %s578_s15, 7 }
  0x3a   : > { %468 = vset.pattern.permute.xlu0 %v589_v0  ;;  %v264_v2 = vld [vmem:[%s799_s2] sm:$0xf]  ;;  %s204_s19 = scalar_lea.vmem [#allocation5], %s396_s7  ;;  %s748_s28 = scalar_lea.hbm %s800_s3, %s404_s24 }
  0x3b   : > { %267 = vperm.xlu0 %468, %v263_v1   ;;  %v207_v3 = vld [vmem:[%s182_s9] sm:$0xff]  ;;  %s304_s21 = sshll.u32 %s204_s19, 4  ;;  %s288_s29 = scalar_lea.sflag [#allocation4], %s722_s5  ;;  %s750_s21 = int_to_ptr.vmem [resolvable:$true] %s304_s21 }
  0x3c   : > { %v209_v4 = vcombine.high %v207_v3, %v207_v3  ;;  %v212_v5 = vsel %vm211_vm0, %v207_v3, 0.0  ;;  %s504_s30 = scalar_lea.vmem %s750_s21, 128  ;;  %p809_p9 = scmp.ne.s32.totalorder %s804_s25, 0 }
  0x3d   : > { %v213_v7 = vrot.slane %v212_v5, 4  ;;  %p505_p8 = scmp.ne.s32.totalorder %s750_s21, %s504_s30  ;;  %s590_s15 = smov [#allocation5]  }
  0x3e   : > { %v219_v6 = vsel %vm211_vm0, %v209_v4, 0.0  ;;  %s508_s4 = sshll.u32 %s590_s15, 4  ;;  %s509_s4 = int_to_ptr.vmem [resolvable:$false] %s508_s4 }
  0x3f   : > { %277 = vperm.xlu0 %468, %v264_v2   ;;  %v220_v8 = vrot.slane %v219_v6, 4  ;;  %v214_v9 = vadd.f32 %v213_v7, %v212_v5  ;;  %p506_p11 = pnand %p505_p8, %p809_p9  ;;  %s510_s7 = scalar_lea.vmem %s509_s4, 256 }
  0x40   : > { %p511_p7 = scmp.lt.s32.totalorder %s750_s21, %s509_s4  ;;  %p512_p13 = scmp.lt.s32.totalorder %s510_s7, %s504_s30 }
  0x41   : > { %v221_v10 = vadd.f32 %v220_v8, %v219_v6  ;;  %v215_v11 = vrot.slane %v214_v9, 2  ;;  %p507_p0 = pneg %p506_p11 }
  0x42   : > { %p513_p3 = por %p512_p13, %p511_p7 }
  0x43   : > { %v222_v12 = vrot.slane %v221_v10, 2  ;;  %v216_v13 = vadd.f32 %v215_v11, %v214_v9 }
  0x44   : > { %p514_p6 = pnand %p513_p3, %p507_p0 }
  0x45   : > { %v223_v14 = vadd.f32 %v222_v12, %v221_v10  ;;  %v217_v15 = vrot.slane %v216_v13, 1 }
  0x47   : > { %v224_v16 = vrot.slane %v223_v14, 1  ;;  %v218_v17 = vadd.f32 %v217_v15, %v216_v13 }
  0x49   : > { %v225_v18 = vadd.f32 %v224_v16, %v223_v14  ;;  %v227_v19 = vmul.f32 0.25, %v218_v17 }
  0x4b   : > { %v228_v20 = vmul.f32 0.25, %v225_v18 }
  0x4d   : > { %v231_v21 = vcombine.low %v227_v19, %v228_v20 }
  0x4f   : > { %v233_v22 = vsub.f32 %v207_v3, %v231_v21 }
  0x51   : > { %v234_v23 = vmul.f32 %v233_v22, %v233_v22 }
  0x53   : > { %v236_v24 = vcombine.high %v234_v23, %v234_v23  ;;  %v238_v25 = vsel %vm211_vm0, %v234_v23, 0.0 }
  0x54   : > { %v239_v27 = vrot.slane %v238_v25, 4 }
  0x55   : > { %v245_v26 = vsel %vm211_vm0, %v236_v24, 0.0 }
  0x56   : > { %v246_v28 = vrot.slane %v245_v26, 4  ;;  %v240_v29 = vadd.f32 %v239_v27, %v238_v25 }
  0x58   : > { %v247_v30 = vadd.f32 %v246_v28, %v245_v26  ;;  %v241_v31 = vrot.slane %v240_v29, 2 }
  0x5a   : > { %v248_v32 = vrot.slane %v247_v30, 2  ;;  %v242_v33 = vadd.f32 %v241_v31, %v240_v29 }
  0x5c   : > { %v249_v34 = vadd.f32 %v248_v32, %v247_v30  ;;  %v243_v35 = vrot.slane %v242_v33, 1 }
  0x5e   : > { %v250_v36 = vrot.slane %v249_v34, 1  ;;  %v244_v37 = vadd.f32 %v243_v35, %v242_v33 }
  0x60   : > { %v251_v38 = vadd.f32 %v250_v36, %v249_v34  ;;  %v252_v39 = vmul.f32 0.25, %v244_v37 }
  0x62   : > { %v253_v40 = vmul.f32 0.25, %v251_v38  ;;  %v254_v41 = vadd.f32 1e-06, %v252_v39 }
  0x64   : > { %v255_v42 = vadd.f32 1e-06, %v253_v40  ;;  %470 = vrsqrt.f32 %v254_v41 }
  0x66   : > { %472 = vrsqrt.f32 %v255_v42 }
  0x6e   : > { %v471_v43 = vpop.eup %470 }
  0x70   : > { %v473_v44 = vpop.eup %472 }
  0x71   : > { %v260_v45 = vcombine.low %v471_v43, %v473_v44 }
  0x73   : > { %v262_v46 = vmul.f32 %v260_v45, %v233_v22 }
  0x75   : > { %v271_v47 = vcombine.high %v262_v46, %v262_v46 }
  0xba   : > { %v268_v48 = vpop.permute.xlu0 %267 }
  0xbb   : > { %v273_v49 = vmul.f32 %v268_v48, %v262_v46  ;;  %v274_v50 = vmul.f32 %v271_v47, %v268_v48 }
  0xbe   : > { %v278_v51 = vpop.permute.xlu0 %277 }
  0xbf   : > { %v280_v52 = vadd.f32 %v278_v51, %v273_v49  ;;  %v281_v53 = vadd.f32 %v278_v51, %v274_v50 }
  0xc1   : > { %v284_v54 = vcombine.low %v280_v52, %v281_v53 }
  0xc3   : > { %286 = vst [vmem:[%s204_s19] sm:$0xff] %v284_v54 }
  0xc4   : > { %517 = shalt.err (!%p514_p6)
}
  0xc5   : > { %s518_s5 = scalar_lea.hbm %s748_s28, 128  ;;  %s522_s6 = scalar_lea.hbm %s800_s3, 256 }
  0xc6   : > { %p519_p4 = scmp.ne.s32.totalorder %s748_s28, %s518_s5  ;;  %p523_p1 = scmp.lt.u32.totalorder %s748_s28, %s800_s3 }
  0xc7   : > { %p524_p2 = scmp.lt.u32.totalorder %s522_s6, %s518_s5  ;;  %p526_p8 = scmp.lt.u32.totalorder %s518_s5, %s748_s28 }
  0xc8   : > { %p520_p10 = pnand %p519_p4, %p809_p9 }
  0xc9   : > { %p525_p5 = por %p524_p2, %p523_p1 }
  0xca   : > { %p521_p12 = pneg %p520_p10 }
  0xcb   : > { %p527_p11 = por %p526_p8, %p525_p5 }
  0xcd   : > { %p528_p0 = pnand %p527_p11, %p521_p12 }
  0xcf   : > { %531 = shalt.err (!%p528_p0)
}
  0xd0   : > { %407 = dma.vmem_to_hbm [thread:$0]  (%p809_p9), %s750_s21, 128, %s748_s28, %s288_s29  }
  0xd1 PF: > { %s316_s18 = sand.u32 1, %s566_s12   ;;  %p810_p7 = scmp.ne.s32.totalorder %s805_s27, 0 }
  0xd2   : > { %p811_p13 = scmp.ge.s32.totalorder %s586_s17, 2  ;;  %s317_s24 = scalar_lea.sflag [#allocation4], %s316_s18 }
  0xd4   : > { %p414_p3 = pnand %p811_p13, %p810_p7 }
  0xd6   : > { %561 = dma.done.wait (!%p414_p3), %s317_s24, 128  }
  0xd7   : > { %563 = vsyncadd (!%p414_p3), %s317_s24, 4294967168  ;;  %s19_s17 = sadd.s32 1, %s586_s17   ;;  %s812_s12 = smov %s570_s13 }
  0xd8   : > { %p16_p6 = scmp.ge.s32.totalorder %s19_s17, 4   ;;  %s813_s13 = smov %s574_s14 }
  0xd9   : > { %s814_s14 = smov %s667_s26  ;;  %s815_s15 = smov %s582_s16 }
  0xda   : > { %s816_s16 = smov %s818_s20  ;;  %18 = sbr.rel (!%p16_p6) target bundleno = 6 (0x6), region = 77 }
  0xe1   :  { %322 = vsyncpa [#allocation3], 1 }
  0xe2   :  { %324 = vsyncpa [#allocation3 + $0x1], 1 }
  0xe3   :  { %325 = vsyncpa [#allocation4], 1 }
  0xe4   :  { %327 = vsyncpa [#allocation4 + $0x1], 1 }

</bundles_post_ra>
